<compile_context>
chip_gen: v7x
topology: tpu7x:2x2x1
jax: 0.10.0
libtpu: 0.0.40
codegen_flags: <defaults>
</compile_context>

<pallas_src>
import functools
from collections import deque

import numpy as np
import jax
import jax.numpy as jnp
from jax.experimental import pallas as pl
from jax.experimental.pallas import tpu as pltpu


# ---------------------------------------------------------------------------
# Pallas kernels
# ---------------------------------------------------------------------------
def _proj_kernel(et_ref, xs_ref, c_ref, *, kp, sp, fp):
    """Per-node spectral projection.

    et_ref : [B, kp*sp]  f32   Et[u, k*sp+s] = E_u[s, k]
    xs_ref : [sp, B, fp] f32   xs[s, u, :]  = n_u * x[nodes_u[s], :]
    c_ref  : [B, kp*fp]  bf16  lane-dense output C[u, k*fp+f]
    """
    et = et_ref[...]                                   # small [B, kp*sp]
    b = et.shape[0]
    for k in range(kp):                                # static unroll (small)
        ck = jnp.zeros((b, fp), dtype=jnp.float32)
        for s in range(sp):                            # static unroll (small)
            w = et[:, k * sp + s:k * sp + s + 1]       # [B, 1]
            ck = ck + w * xs_ref[s]                    # VPU broadcast-FMA [B, fp]
        c_ref[:, k * fp:(k + 1) * fp] = ck.astype(c_ref.dtype)


def _agg_kernel(a_ref, c_ref, sw_ref, xf0_ref, out_ref, acc_ref, *, kp, fp):
    """Neighbor aggregation + finalize.

    a_ref   : [tv, tu]     bf16   adjacency tile
    c_ref   : [tu, kp*fp]  bf16   projected coefficients tile
    sw_ref  : [tv, kp]     f32    colsum(E_v)/deg_v  (0 if deg==0)
    xf0_ref : [tv, fp]     f32    x[v] where deg==0 else 0
    out_ref : [tv, fp]     f32
    acc_ref : [tv, kp*fp]  f32    VMEM accumulator scratch
    """
    j = pl.program_id(1)

    @pl.when(j == 0)
    def _init():
        acc_ref[...] = jnp.zeros_like(acc_ref)

    # single flattened bf16 MXU matmul, f32 accumulation
    acc_ref[...] += jnp.dot(a_ref[...], c_ref[...],
                            preferred_element_type=jnp.float32)

    @pl.when(j == pl.num_programs(1) - 1)
    def _finalize():
        sw = sw_ref[...]
        r = xf0_ref[...]
        for k in range(kp):                            # static unroll (small)
            r = r + sw[:, k:k + 1] * acc_ref[:, k * fp:(k + 1) * fp]
        out_ref[...] = r                               # lane-dense 128-wide store


# ---------------------------------------------------------------------------
# Host-side graph preprocessing (glue; no clean Pallas equivalent)
# ---------------------------------------------------------------------------
def build_adj_list(edge_index, num_nodes):
    adj = [[] for _ in range(num_nodes)]
    for i in range(edge_index.shape[1]):
        s, d = int(edge_index[0, i]), int(edge_index[1, i])
        adj[s].append(d)
        adj[d].append(s)
    return adj


def get_subgraph(edge_index, node_idx, sub_nodes, adj_list):
    visited = {node_idx}
    queue = deque([node_idx])
    while queue and len(visited) < sub_nodes:
        cur = queue.popleft()
        for nb in adj_list[cur]:
            if nb not in visited:
                visited.add(nb)
                queue.append(nb)
                if len(visited) >= sub_nodes:
                    break
    nodes = sorted(visited)
    sub_edges = []
    node_map = {o: n for n, o in enumerate(nodes)}
    for i in range(edge_index.shape[1]):
        s, d = int(edge_index[0, i]), int(edge_index[1, i])
        if s in visited and d in visited:
            sub_edges.append((node_map[s], node_map[d]))
    return nodes, sub_edges


def laplacian_eigenfuncs(sub_edges, n_sub, dY):
    # directed adjacency (matches to_scipy_sparse_matrix: one entry per edge)
    A = np.zeros((n_sub, n_sub), dtype=np.float64)
    for s, d in sub_edges:
        A[s, d] += 1.0
    degree = A.sum(1)
    with np.errstate(divide="ignore"):
        dinv = np.power(degree, -0.5)
    dinv[np.isinf(dinv)] = 0.0
    D = np.diag(dinv)
    L = np.eye(n_sub) - D @ A @ D
    k = min(dY, n_sub - 1)
    # TODO(synk): BFS + eigendecomposition (np.linalg.eigh) stay on host; no Pallas equivalent.
    _, vecs = np.linalg.eigh(L)
    return vecs[:, :k].astype(np.float32)


def _round_up(a, b):
    return ((a + b - 1) // b) * b


def _vmem_limit_bytes(block_bytes, scratch_bytes=0):
    # double-buffered pipelined blocks + scratch, with 2x headroom
    est = 2 * block_bytes + scratch_bytes
    return int(min(max(2 * est, 16 * 1024 * 1024), 48 * 1024 * 1024))


def _preprocess(x, edge_index, dY, sub_nodes, tile_node=256):
    x = np.asarray(x, dtype=np.float32)
    edge_index = np.asarray(edge_index)
    N, F = x.shape
    adj_list = build_adj_list(edge_index, N)

    # undirected unique-neighbor sets (matches get_neighbors)
    nbrs = [set() for _ in range(N)]
    for i in range(edge_index.shape[1]):
        s, d = int(edge_index[0, i]), int(edge_index[1, i])
        nbrs[s].add(d)
        nbrs[d].add(s)

    tile = min(tile_node, _round_up(N, 8))
    Np = _round_up(N, tile)
    Sp = int(sub_nodes)
    Kp = int(dY)
    Fp = _round_up(F, 128)

    EtT = np.zeros((Np, Kp * Sp), np.float32)   # EtT[u, k*Sp+s] = E_u[s, k]
    XsS = np.zeros((Sp, Np, Fp), np.float32)    # XsS[s, u, :]   = n_u * x[nodes_u[s]]
    sw = np.zeros((Np, Kp), np.float32)         # colsum(E_v)[k] / deg_v
    xf0 = np.zeros((Np, Fp), np.float32)        # x[v] if deg_v == 0 else 0
    A = np.zeros((Np, Np), np.float32)          # undirected 0/1 neighbor matrix

    for u in range(N):
        nodes, sub_edges = get_subgraph(edge_index, u, sub_nodes, adj_list)
        n_sub = len(nodes)
        E = laplacian_eigenfuncs(sub_edges, n_sub, dY)      # [n_sub, kk]
        kk = E.shape[1]
        for k in range(kk):
            EtT[u, k * Sp:k * Sp + n_sub] = E[:, k]
        # fold n_u into Xs (NOT into Et) -- keeps s_v = colsum(E_v) correct
        XsS[:n_sub, u, :F] = x[nodes] * float(n_sub)
        deg = len(nbrs[u])
        if deg > 0:
            sw[u, :kk] = E.sum(axis=0) / float(deg)
            for w in nbrs[u]:
                A[u, w] = 1.0
        else:
            xf0[u, :F] = x[u]

    return dict(N=N, F=F, Np=Np, Sp=Sp, Kp=Kp, Fp=Fp, tile=tile,
                EtT=EtT, XsS=XsS, sw=sw, xf0=xf0, A=A)


# ---------------------------------------------------------------------------
# Pallas-call wrappers
# ---------------------------------------------------------------------------
def _project_pallas(pre):
    Np, Sp, Kp, Fp, tile = pre["Np"], pre["Sp"], pre["Kp"], pre["Fp"], pre["tile"]
    block_bytes = (tile * Kp * Sp * 4          # Et tile (f32)
                   + Sp * tile * Fp * 4        # Xs tile (f32)
                   + tile * Kp * Fp * 2)       # C tile  (bf16)
    return pl.pallas_call(
        functools.partial(_proj_kernel, kp=Kp, sp=Sp, fp=Fp),
        out_shape=jax.ShapeDtypeStruct((Np, Kp * Fp), jnp.bfloat16),
        grid_spec=pltpu.PrefetchScalarGridSpec(
            num_scalar_prefetch=0,
            grid=(Np // tile,),
            in_specs=[
                pl.BlockSpec((tile, Kp * Sp), lambda i: (i, 0)),
                pl.BlockSpec((Sp, tile, Fp), lambda i: (0, i, 0)),
            ],
            out_specs=pl.BlockSpec((tile, Kp * Fp), lambda i: (i, 0)),
        ),
        compiler_params=pltpu.CompilerParams(
            dimension_semantics=("parallel",),
            vmem_limit_bytes=_vmem_limit_bytes(block_bytes),
        ),
    )(jnp.asarray(pre["EtT"]), jnp.asarray(pre["XsS"]))


def _aggregate_pallas(pre, c):
    Np, Kp, Fp, tile = pre["Np"], pre["Kp"], pre["Fp"], pre["tile"]
    KF = Kp * Fp
    block_bytes = (tile * tile * 2             # A tile (bf16)
                   + tile * KF * 2             # C tile (bf16)
                   + tile * Kp * 4             # sw tile
                   + tile * Fp * 4             # xf0 tile
                   + tile * Fp * 4)            # out tile
    scratch_bytes = tile * KF * 4
    a_bf16 = jnp.asarray(pre["A"], dtype=jnp.bfloat16)   # 0/1 values: exact in bf16
    return pl.pallas_call(
        functools.partial(_agg_kernel, kp=Kp, fp=Fp),
        out_shape=jax.ShapeDtypeStruct((Np, Fp), jnp.float32),
        grid_spec=pltpu.PrefetchScalarGridSpec(
            num_scalar_prefetch=0,
            grid=(Np // tile, Np // tile),          # (v tiles, u tiles); u = reduction
            in_specs=[
                pl.BlockSpec((tile, tile), lambda i, j: (i, j)),   # A
                pl.BlockSpec((tile, KF), lambda i, j: (j, 0)),     # C
                pl.BlockSpec((tile, Kp), lambda i, j: (i, 0)),     # sw
                pl.BlockSpec((tile, Fp), lambda i, j: (i, 0)),     # xf0
            ],
            out_specs=pl.BlockSpec((tile, Fp), lambda i, j: (i, 0)),
            scratch_shapes=[pltpu.VMEM((tile, KF), jnp.float32)],
        ),
        compiler_params=pltpu.CompilerParams(
            dimension_semantics=("parallel", "arbitrary"),
            vmem_limit_bytes=_vmem_limit_bytes(block_bytes, scratch_bytes),
        ),
        cost_estimate=pl.CostEstimate(
            flops=int(2 * Np * Np * KF + 2 * Np * KF),
            transcendentals=0,
            bytes_accessed=int(Np * Np * 2 + (Np // tile) * Np * KF * 2
                               + 2 * Np * Fp * 4 + Np * Kp * 4),
        ),
    )(a_bf16, c, jnp.asarray(pre["sw"]), jnp.asarray(pre["xf0"]))


def local_laplacian_message_passing(x, edge_index, dY, sub_nodes, *, return_debug=False):
    pre = _preprocess(x, edge_index, dY, sub_nodes)
    c = _project_pallas(pre)                 # [Np, Kp*Fp] bf16
    out_pad = _aggregate_pallas(pre, c)      # [Np, Fp]    f32
    out = out_pad[:pre["N"], :pre["F"]]
    if return_debug:
        return out, c, out_pad, pre
    return out


# ---------------------------------------------------------------------------
# Pure numpy reference (follows the PyTorch forward literally)
# ---------------------------------------------------------------------------
def reference_forward(x, edge_index, dY, sub_nodes):
    x = np.asarray(x, dtype=np.float32)
    edge_index = np.asarray(edge_index)
    N, F = x.shape
    adj_list = build_adj_list(edge_index, N)
    cache = {}
    for v in range(N):
        nodes, sub_edges = get_subgraph(edge_index, v, sub_nodes, adj_list)
        E = laplacian_eigenfuncs(sub_edges, len(nodes), dY)
        cache[v] = (nodes, E)
    x_new = np.zeros_like(x)
    for v in range(N):
        _, E_v = cache[v]
        nbs = set()
        for i in range(edge_index.shape[1]):
            s, d = int(edge_index[0, i]), int(edge_index[1, i])
            if s == v:
                nbs.add(d)
            elif d == v:
                nbs.add(s)
        nbs = list(nbs)
        if len(nbs) == 0:
            x_new[v] = x[v]
            continue
        acc = np.zeros(F, np.float32)
        for u in nbs:
            nodes_u, E_u = cache[u]
            c_u = E_u.T @ x[nodes_u] * len(nodes_u)
            acc += (E_v @ c_u).sum(0)
        x_new[v] = acc / len(nbs)
    return x_new


if __name__ == "__main__":
    num_nodes = 12
    num_features = 8
    dY = 4
    sub_nodes = 6

    key = jax.random.PRNGKey(0)
    x = np.asarray(jax.random.normal(key, (num_nodes, num_features), dtype=jnp.float32))
    # deterministic ring graph (every node has exactly 2 undirected neighbors)
    src = np.arange(num_nodes)
    dst = (src + 1) % num_nodes
    edge_index = np.stack([src, dst]).astype(np.int64)

    out, c_dev, out_pad, pre = local_laplacian_message_passing(
        x, edge_index, dY, sub_nodes, return_debug=True)
    out = np.asarray(jax.block_until_ready(out))
    out_pad = np.asarray(jax.block_until_ready(out_pad))
    c_host = np.asarray(jax.block_until_ready(c_dev)).astype(np.float32)

    Np, Sp, Kp, Fp = pre["Np"], pre["Sp"], pre["Kp"], pre["Fp"]

    # 1) projection kernel vs f32 reference of the same packed arrays (bf16 headroom)
    ref_c = np.einsum("nks,snf->nkf",
                      pre["EtT"].reshape(Np, Kp, Sp), pre["XsS"]).reshape(Np, Kp * Fp)
    np.testing.assert_allclose(c_host, ref_c, rtol=1.6e-2, atol=1e-2)

    # 2) aggregation + finalize vs exact math on the kernel's own (bf16) C (tight)
    agg = (pre["A"].astype(np.float32) @ c_host).reshape(Np, Kp, Fp)
    ref_out_pad = (pre["sw"][:, :, None] * agg).sum(1) + pre["xf0"]
    np.testing.assert_allclose(out_pad, ref_out_pad, rtol=1e-3, atol=1e-3)

    # 3) end-to-end vs literal reference (loose: bf16 quantization of C is intentional)
    ref = reference_forward(x, edge_index, dY, sub_nodes)
    np.testing.assert_allclose(out, ref, rtol=1e-1, atol=1e-1)

    print("KERNEL_OK")
</pallas_src>

<mosaic_0001>
module attributes {stable_mosaic.version = 11 : i64} {
  func.func @_proj_kernel(%arg0: i32, %arg1: memref<16x24xf32, #tpu.memory_space<vmem>>, %arg2: memref<6x16x128xf32, #tpu.memory_space<vmem>>, %arg3: memref<16x512xbf16, #tpu.memory_space<vmem>>) attributes {dimension_semantics = [#tpu.dimension_semantics<parallel>], iteration_bounds = array<i64: 1>, scalar_prefetch = 0 : i64, scratch_operands = 0 : i64, tpu.core_type = #tpu.core_type<tc>, window_params = [{transform_indices = @transform_0, window_bounds = array<i64: 16, 24>}, {transform_indices = @transform_1, window_bounds = array<i64: 6, 16, 128>}, {transform_indices = @transform_2, window_bounds = array<i64: 16, 512>}]} {
    %c0 = arith.constant 0 : index
    %c0_0 = arith.constant 0 : index
    %0 = vector.load %arg1[%c0, %c0_0] : memref<16x24xf32, #tpu.memory_space<vmem>>, vector<16x24xf32>
    %cst = arith.constant 0.000000e+00 : f32
    %1 = vector.broadcast %cst : f32 to vector<16x128xf32>
    %2 = vector.extract_strided_slice %0 {offsets = [0, 0], sizes = [16, 1], strides = [1, 1]} : vector<16x24xf32> to vector<16x1xf32>
    %c0_1 = arith.constant 0 : index
    %c0_2 = arith.constant 0 : index
    %c0_3 = arith.constant 0 : index
    %3 = vector.load %arg2[%c0_1, %c0_2, %c0_3] : memref<6x16x128xf32, #tpu.memory_space<vmem>>, vector<1x16x128xf32>
    %4 = vector.shape_cast %3 : vector<1x16x128xf32> to vector<16x128xf32>
    %5 = vector.broadcast %2 : vector<16x1xf32> to vector<16x128xf32>
    %6 = arith.mulf %5, %4 : vector<16x128xf32>
    %7 = arith.addf %1, %6 : vector<16x128xf32>
    %8 = vector.extract_strided_slice %0 {offsets = [0, 1], sizes = [16, 1], strides = [1, 1]} : vector<16x24xf32> to vector<16x1xf32>
    %c1 = arith.constant 1 : index
    %c0_4 = arith.constant 0 : index
    %c0_5 = arith.constant 0 : index
    %9 = vector.load %arg2[%c1, %c0_4, %c0_5] : memref<6x16x128xf32, #tpu.memory_space<vmem>>, vector<1x16x128xf32>
    %10 = vector.shape_cast %9 : vector<1x16x128xf32> to vector<16x128xf32>
    %11 = vector.broadcast %8 : vector<16x1xf32> to vector<16x128xf32>
    %12 = arith.mulf %11, %10 : vector<16x128xf32>
    %13 = arith.addf %7, %12 : vector<16x128xf32>
    %14 = vector.extract_strided_slice %0 {offsets = [0, 2], sizes = [16, 1], strides = [1, 1]} : vector<16x24xf32> to vector<16x1xf32>
    %c2 = arith.constant 2 : index
    %c0_6 = arith.constant 0 : index
    %c0_7 = arith.constant 0 : index
    %15 = vector.load %arg2[%c2, %c0_6, %c0_7] : memref<6x16x128xf32, #tpu.memory_space<vmem>>, vector<1x16x128xf32>
    %16 = vector.shape_cast %15 : vector<1x16x128xf32> to vector<16x128xf32>
    %17 = vector.broadcast %14 : vector<16x1xf32> to vector<16x128xf32>
    %18 = arith.mulf %17, %16 : vector<16x128xf32>
    %19 = arith.addf %13, %18 : vector<16x128xf32>
    %20 = vector.extract_strided_slice %0 {offsets = [0, 3], sizes = [16, 1], strides = [1, 1]} : vector<16x24xf32> to vector<16x1xf32>
    %c3 = arith.constant 3 : index
    %c0_8 = arith.constant 0 : index
    %c0_9 = arith.constant 0 : index
    %21 = vector.load %arg2[%c3, %c0_8, %c0_9] : memref<6x16x128xf32, #tpu.memory_space<vmem>>, vector<1x16x128xf32>
    %22 = vector.shape_cast %21 : vector<1x16x128xf32> to vector<16x128xf32>
    %23 = vector.broadcast %20 : vector<16x1xf32> to vector<16x128xf32>
    %24 = arith.mulf %23, %22 : vector<16x128xf32>
    %25 = arith.addf %19, %24 : vector<16x128xf32>
    %26 = vector.extract_strided_slice %0 {offsets = [0, 4], sizes = [16, 1], strides = [1, 1]} : vector<16x24xf32> to vector<16x1xf32>
    %c4 = arith.constant 4 : index
    %c0_10 = arith.constant 0 : index
    %c0_11 = arith.constant 0 : index
    %27 = vector.load %arg2[%c4, %c0_10, %c0_11] : memref<6x16x128xf32, #tpu.memory_space<vmem>>, vector<1x16x128xf32>
    %28 = vector.shape_cast %27 : vector<1x16x128xf32> to vector<16x128xf32>
    %29 = vector.broadcast %26 : vector<16x1xf32> to vector<16x128xf32>
    %30 = arith.mulf %29, %28 : vector<16x128xf32>
    %31 = arith.addf %25, %30 : vector<16x128xf32>
    %32 = vector.extract_strided_slice %0 {offsets = [0, 5], sizes = [16, 1], strides = [1, 1]} : vector<16x24xf32> to vector<16x1xf32>
    %c5 = arith.constant 5 : index
    %c0_12 = arith.constant 0 : index
    %c0_13 = arith.constant 0 : index
    %33 = vector.load %arg2[%c5, %c0_12, %c0_13] : memref<6x16x128xf32, #tpu.memory_space<vmem>>, vector<1x16x128xf32>
    %34 = vector.shape_cast %33 : vector<1x16x128xf32> to vector<16x128xf32>
    %35 = vector.broadcast %32 : vector<16x1xf32> to vector<16x128xf32>
    %36 = arith.mulf %35, %34 : vector<16x128xf32>
    %37 = arith.addf %31, %36 : vector<16x128xf32>
    %38 = arith.truncf %37 : vector<16x128xf32> to vector<16x128xbf16>
    %c0_14 = arith.constant 0 : index
    %c0_15 = arith.constant 0 : index
    %39 = vector.load %arg3[%c0_14, %c0_15] : memref<16x512xbf16, #tpu.memory_space<vmem>>, vector<16x128xbf16>
    tpu.vector_store %arg3[%c0_14, %c0_15], %38 {strides = array<i32>} : memref<16x512xbf16, #tpu.memory_space<vmem>>, vector<16x128xbf16>,
    %cst_16 = arith.constant 0.000000e+00 : f32
    %40 = vector.broadcast %cst_16 : f32 to vector<16x128xf32>
    %41 = vector.extract_strided_slice %0 {offsets = [0, 6], sizes = [16, 1], strides = [1, 1]} : vector<16x24xf32> to vector<16x1xf32>
    %c0_17 = arith.constant 0 : index
    %c0_18 = arith.constant 0 : index
    %c0_19 = arith.constant 0 : index
    %42 = vector.load %arg2[%c0_17, %c0_18, %c0_19] : memref<6x16x128xf32, #tpu.memory_space<vmem>>, vector<1x16x128xf32>
    %43 = vector.shape_cast %42 : vector<1x16x128xf32> to vector<16x128xf32>
    %44 = vector.broadcast %41 : vector<16x1xf32> to vector<16x128xf32>
    %45 = arith.mulf %44, %43 : vector<16x128xf32>
    %46 = arith.addf %40, %45 : vector<16x128xf32>
    %47 = vector.extract_strided_slice %0 {offsets = [0, 7], sizes = [16, 1], strides = [1, 1]} : vector<16x24xf32> to vector<16x1xf32>
    %c1_20 = arith.constant 1 : index
    %c0_21 = arith.constant 0 : index
    %c0_22 = arith.constant 0 : index
    %48 = vector.load %arg2[%c1_20, %c0_21, %c0_22] : memref<6x16x128xf32, #tpu.memory_space<vmem>>, vector<1x16x128xf32>
    %49 = vector.shape_cast %48 : vector<1x16x128xf32> to vector<16x128xf32>
    %50 = vector.broadcast %47 : vector<16x1xf32> to vector<16x128xf32>
    %51 = arith.mulf %50, %49 : vector<16x128xf32>
    %52 = arith.addf %46, %51 : vector<16x128xf32>
    %53 = vector.extract_strided_slice %0 {offsets = [0, 8], sizes = [16, 1], strides = [1, 1]} : vector<16x24xf32> to vector<16x1xf32>
    %c2_23 = arith.constant 2 : index
    %c0_24 = arith.constant 0 : index
    %c0_25 = arith.constant 0 : index
    %54 = vector.load %arg2[%c2_23, %c0_24, %c0_25] : memref<6x16x128xf32, #tpu.memory_space<vmem>>, vector<1x16x128xf32>
    %55 = vector.shape_cast %54 : vector<1x16x128xf32> to vector<16x128xf32>
    %56 = vector.broadcast %53 : vector<16x1xf32> to vector<16x128xf32>
    %57 = arith.mulf %56, %55 : vector<16x128xf32>
    %58 = arith.addf %52, %57 : vector<16x128xf32>
    %59 = vector.extract_strided_slice %0 {offsets = [0, 9], sizes = [16, 1], strides = [1, 1]} : vector<16x24xf32> to vector<16x1xf32>
    %c3_26 = arith.constant 3 : index
    %c0_27 = arith.constant 0 : index
    %c0_28 = arith.constant 0 : index
    %60 = vector.load %arg2[%c3_26, %c0_27, %c0_28] : memref<6x16x128xf32, #tpu.memory_space<vmem>>, vector<1x16x128xf32>
    %61 = vector.shape_cast %60 : vector<1x16x128xf32> to vector<16x128xf32>
    %62 = vector.broadcast %59 : vector<16x1xf32> to vector<16x128xf32>
    %63 = arith.mulf %62, %61 : vector<16x128xf32>
    %64 = arith.addf %58, %63 : vector<16x128xf32>
    %65 = vector.extract_strided_slice %0 {offsets = [0, 10], sizes = [16, 1], strides = [1, 1]} : vector<16x24xf32> to vector<16x1xf32>
    %c4_29 = arith.constant 4 : index
    %c0_30 = arith.constant 0 : index
    %c0_31 = arith.constant 0 : index
    %66 = vector.load %arg2[%c4_29, %c0_30, %c0_31] : memref<6x16x128xf32, #tpu.memory_space<vmem>>, vector<1x16x128xf32>
    %67 = vector.shape_cast %66 : vector<1x16x128xf32> to vector<16x128xf32>
    %68 = vector.broadcast %65 : vector<16x1xf32> to vector<16x128xf32>
    %69 = arith.mulf %68, %67 : vector<16x128xf32>
    %70 = arith.addf %64, %69 : vector<16x128xf32>
    %71 = vector.extract_strided_slice %0 {offsets = [0, 11], sizes = [16, 1], strides = [1, 1]} : vector<16x24xf32> to vector<16x1xf32>
    %c5_32 = arith.constant 5 : index
    %c0_33 = arith.constant 0 : index
    %c0_34 = arith.constant 0 : index
    %72 = vector.load %arg2[%c5_32, %c0_33, %c0_34] : memref<6x16x128xf32, #tpu.memory_space<vmem>>, vector<1x16x128xf32>
    %73 = vector.shape_cast %72 : vector<1x16x128xf32> to vector<16x128xf32>
    %74 = vector.broadcast %71 : vector<16x1xf32> to vector<16x128xf32>
    %75 = arith.mulf %74, %73 : vector<16x128xf32>
    %76 = arith.addf %70, %75 : vector<16x128xf32>
    %77 = arith.truncf %76 : vector<16x128xf32> to vector<16x128xbf16>
    %c0_35 = arith.constant 0 : index
    %c128 = arith.constant 128 : index
    %78 = vector.load %arg3[%c0_35, %c128] : memref<16x512xbf16, #tpu.memory_space<vmem>>, vector<16x128xbf16>
    tpu.vector_store %arg3[%c0_35, %c128], %77 {strides = array<i32>} : memref<16x512xbf16, #tpu.memory_space<vmem>>, vector<16x128xbf16>,
    %cst_36 = arith.constant 0.000000e+00 : f32
    %79 = vector.broadcast %cst_36 : f32 to vector<16x128xf32>
    %80 = vector.extract_strided_slice %0 {offsets = [0, 12], sizes = [16, 1], strides = [1, 1]} : vector<16x24xf32> to vector<16x1xf32>
    %c0_37 = arith.constant 0 : index
    %c0_38 = arith.constant 0 : index
    %c0_39 = arith.constant 0 : index
    %81 = vector.load %arg2[%c0_37, %c0_38, %c0_39] : memref<6x16x128xf32, #tpu.memory_space<vmem>>, vector<1x16x128xf32>
    %82 = vector.shape_cast %81 : vector<1x16x128xf32> to vector<16x128xf32>
    %83 = vector.broadcast %80 : vector<16x1xf32> to vector<16x128xf32>
    %84 = arith.mulf %83, %82 : vector<16x128xf32>
    %85 = arith.addf %79, %84 : vector<16x128xf32>
    %86 = vector.extract_strided_slice %0 {offsets = [0, 13], sizes = [16, 1], strides = [1, 1]} : vector<16x24xf32> to vector<16x1xf32>
    %c1_40 = arith.constant 1 : index
    %c0_41 = arith.constant 0 : index
    %c0_42 = arith.constant 0 : index
    %87 = vector.load %arg2[%c1_40, %c0_41, %c0_42] : memref<6x16x128xf32, #tpu.memory_space<vmem>>, vector<1x16x128xf32>
    %88 = vector.shape_cast %87 : vector<1x16x128xf32> to vector<16x128xf32>
    %89 = vector.broadcast %86 : vector<16x1xf32> to vector<16x128xf32>
    %90 = arith.mulf %89, %88 : vector<16x128xf32>
    %91 = arith.addf %85, %90 : vector<16x128xf32>
    %92 = vector.extract_strided_slice %0 {offsets = [0, 14], sizes = [16, 1], strides = [1, 1]} : vector<16x24xf32> to vector<16x1xf32>
    %c2_43 = arith.constant 2 : index
    %c0_44 = arith.constant 0 : index
    %c0_45 = arith.constant 0 : index
    %93 = vector.load %arg2[%c2_43, %c0_44, %c0_45] : memref<6x16x128xf32, #tpu.memory_space<vmem>>, vector<1x16x128xf32>
    %94 = vector.shape_cast %93 : vector<1x16x128xf32> to vector<16x128xf32>
    %95 = vector.broadcast %92 : vector<16x1xf32> to vector<16x128xf32>
    %96 = arith.mulf %95, %94 : vector<16x128xf32>
    %97 = arith.addf %91, %96 : vector<16x128xf32>
    %98 = vector.extract_strided_slice %0 {offsets = [0, 15], sizes = [16, 1], strides = [1, 1]} : vector<16x24xf32> to vector<16x1xf32>
    %c3_46 = arith.constant 3 : index
    %c0_47 = arith.constant 0 : index
    %c0_48 = arith.constant 0 : index
    %99 = vector.load %arg2[%c3_46, %c0_47, %c0_48] : memref<6x16x128xf32, #tpu.memory_space<vmem>>, vector<1x16x128xf32>
    %100 = vector.shape_cast %99 : vector<1x16x128xf32> to vector<16x128xf32>
    %101 = vector.broadcast %98 : vector<16x1xf32> to vector<16x128xf32>
    %102 = arith.mulf %101, %100 : vector<16x128xf32>
    %103 = arith.addf %97, %102 : vector<16x128xf32>
    %104 = vector.extract_strided_slice %0 {offsets = [0, 16], sizes = [16, 1], strides = [1, 1]} : vector<16x24xf32> to vector<16x1xf32>
    %c4_49 = arith.constant 4 : index
    %c0_50 = arith.constant 0 : index
    %c0_51 = arith.constant 0 : index
    %105 = vector.load %arg2[%c4_49, %c0_50, %c0_51] : memref<6x16x128xf32, #tpu.memory_space<vmem>>, vector<1x16x128xf32>
    %106 = vector.shape_cast %105 : vector<1x16x128xf32> to vector<16x128xf32>
    %107 = vector.broadcast %104 : vector<16x1xf32> to vector<16x128xf32>
    %108 = arith.mulf %107, %106 : vector<16x128xf32>
    %109 = arith.addf %103, %108 : vector<16x128xf32>
    %110 = vector.extract_strided_slice %0 {offsets = [0, 17], sizes = [16, 1], strides = [1, 1]} : vector<16x24xf32> to vector<16x1xf32>
    %c5_52 = arith.constant 5 : index
    %c0_53 = arith.constant 0 : index
    %c0_54 = arith.constant 0 : index
    %111 = vector.load %arg2[%c5_52, %c0_53, %c0_54] : memref<6x16x128xf32, #tpu.memory_space<vmem>>, vector<1x16x128xf32>
    %112 = vector.shape_cast %111 : vector<1x16x128xf32> to vector<16x128xf32>
    %113 = vector.broadcast %110 : vector<16x1xf32> to vector<16x128xf32>
    %114 = arith.mulf %113, %112 : vector<16x128xf32>
    %115 = arith.addf %109, %114 : vector<16x128xf32>
    %116 = arith.truncf %115 : vector<16x128xf32> to vector<16x128xbf16>
    %c0_55 = arith.constant 0 : index
    %c256 = arith.constant 256 : index
    %117 = vector.load %arg3[%c0_55, %c256] : memref<16x512xbf16, #tpu.memory_space<vmem>>, vector<16x128xbf16>
    tpu.vector_store %arg3[%c0_55, %c256], %116 {strides = array<i32>} : memref<16x512xbf16, #tpu.memory_space<vmem>>, vector<16x128xbf16>,
    %cst_56 = arith.constant 0.000000e+00 : f32
    %118 = vector.broadcast %cst_56 : f32 to vector<16x128xf32>
    %119 = vector.extract_strided_slice %0 {offsets = [0, 18], sizes = [16, 1], strides = [1, 1]} : vector<16x24xf32> to vector<16x1xf32>
    %c0_57 = arith.constant 0 : index
    %c0_58 = arith.constant 0 : index
    %c0_59 = arith.constant 0 : index
    %120 = vector.load %arg2[%c0_57, %c0_58, %c0_59] : memref<6x16x128xf32, #tpu.memory_space<vmem>>, vector<1x16x128xf32>
    %121 = vector.shape_cast %120 : vector<1x16x128xf32> to vector<16x128xf32>
    %122 = vector.broadcast %119 : vector<16x1xf32> to vector<16x128xf32>
    %123 = arith.mulf %122, %121 : vector<16x128xf32>
    %124 = arith.addf %118, %123 : vector<16x128xf32>
    %125 = vector.extract_strided_slice %0 {offsets = [0, 19], sizes = [16, 1], strides = [1, 1]} : vector<16x24xf32> to vector<16x1xf32>
    %c1_60 = arith.constant 1 : index
    %c0_61 = arith.constant 0 : index
    %c0_62 = arith.constant 0 : index
    %126 = vector.load %arg2[%c1_60, %c0_61, %c0_62] : memref<6x16x128xf32, #tpu.memory_space<vmem>>, vector<1x16x128xf32>
    %127 = vector.shape_cast %126 : vector<1x16x128xf32> to vector<16x128xf32>
    %128 = vector.broadcast %125 : vector<16x1xf32> to vector<16x128xf32>
    %129 = arith.mulf %128, %127 : vector<16x128xf32>
    %130 = arith.addf %124, %129 : vector<16x128xf32>
    %131 = vector.extract_strided_slice %0 {offsets = [0, 20], sizes = [16, 1], strides = [1, 1]} : vector<16x24xf32> to vector<16x1xf32>
    %c2_63 = arith.constant 2 : index
    %c0_64 = arith.constant 0 : index
    %c0_65 = arith.constant 0 : index
    %132 = vector.load %arg2[%c2_63, %c0_64, %c0_65] : memref<6x16x128xf32, #tpu.memory_space<vmem>>, vector<1x16x128xf32>
    %133 = vector.shape_cast %132 : vector<1x16x128xf32> to vector<16x128xf32>
    %134 = vector.broadcast %131 : vector<16x1xf32> to vector<16x128xf32>
    %135 = arith.mulf %134, %133 : vector<16x128xf32>
    %136 = arith.addf %130, %135 : vector<16x128xf32>
    %137 = vector.extract_strided_slice %0 {offsets = [0, 21], sizes = [16, 1], strides = [1, 1]} : vector<16x24xf32> to vector<16x1xf32>
    %c3_66 = arith.constant 3 : index
    %c0_67 = arith.constant 0 : index
    %c0_68 = arith.constant 0 : index
    %138 = vector.load %arg2[%c3_66, %c0_67, %c0_68] : memref<6x16x128xf32, #tpu.memory_space<vmem>>, vector<1x16x128xf32>
    %139 = vector.shape_cast %138 : vector<1x16x128xf32> to vector<16x128xf32>
    %140 = vector.broadcast %137 : vector<16x1xf32> to vector<16x128xf32>
    %141 = arith.mulf %140, %139 : vector<16x128xf32>
    %142 = arith.addf %136, %141 : vector<16x128xf32>
    %143 = vector.extract_strided_slice %0 {offsets = [0, 22], sizes = [16, 1], strides = [1, 1]} : vector<16x24xf32> to vector<16x1xf32>
    %c4_69 = arith.constant 4 : index
    %c0_70 = arith.constant 0 : index
    %c0_71 = arith.constant 0 : index
    %144 = vector.load %arg2[%c4_69, %c0_70, %c0_71] : memref<6x16x128xf32, #tpu.memory_space<vmem>>, vector<1x16x128xf32>
    %145 = vector.shape_cast %144 : vector<1x16x128xf32> to vector<16x128xf32>
    %146 = vector.broadcast %143 : vector<16x1xf32> to vector<16x128xf32>
    %147 = arith.mulf %146, %145 : vector<16x128xf32>
    %148 = arith.addf %142, %147 : vector<16x128xf32>
    %149 = vector.extract_strided_slice %0 {offsets = [0, 23], sizes = [16, 1], strides = [1, 1]} : vector<16x24xf32> to vector<16x1xf32>
    %c5_72 = arith.constant 5 : index
    %c0_73 = arith.constant 0 : index
    %c0_74 = arith.constant 0 : index
    %150 = vector.load %arg2[%c5_72, %c0_73, %c0_74] : memref<6x16x128xf32, #tpu.memory_space<vmem>>, vector<1x16x128xf32>
    %151 = vector.shape_cast %150 : vector<1x16x128xf32> to vector<16x128xf32>
    %152 = vector.broadcast %149 : vector<16x1xf32> to vector<16x128xf32>
    %153 = arith.mulf %152, %151 : vector<16x128xf32>
    %154 = arith.addf %148, %153 : vector<16x128xf32>
    %155 = arith.truncf %154 : vector<16x128xf32> to vector<16x128xbf16>
    %c0_75 = arith.constant 0 : index
    %c384 = arith.constant 384 : index
    %156 = vector.load %arg3[%c0_75, %c384] : memref<16x512xbf16, #tpu.memory_space<vmem>>, vector<16x128xbf16>
    tpu.vector_store %arg3[%c0_75, %c384], %155 {strides = array<i32>} : memref<16x512xbf16, #tpu.memory_space<vmem>>, vector<16x128xbf16>,
    return
  }
  func.func @transform_0(%arg0: i32) -> (i32, i32) {
    %c0_i32 = arith.constant 0 : i32
    %c0_i32_0 = arith.constant 0 : i32
    return %arg0, %c0_i32 : i32, i32
  }
  func.func @transform_1(%arg0: i32) -> (i32, i32, i32) {
    %c0_i32 = arith.constant 0 : i32
    %c0_i32_0 = arith.constant 0 : i32
    %c0_i32_1 = arith.constant 0 : i32
    return %c0_i32, %arg0, %c0_i32_0 : i32, i32, i32
  }
  func.func @transform_2(%arg0: i32) -> (i32, i32) {
    %c0_i32 = arith.constant 0 : i32
    %c0_i32_0 = arith.constant 0 : i32
    return %arg0, %c0_i32 : i32, i32
  }
}

</mosaic_0001>

<bundles_post_ra>
// kernel: tpu_custom_call.1
= control target key start
LH: loop header
LB: loop body
LE: loop exit
PB: predicated region body
PF: predicated region fallthrough
CT: control target
= control target key end

     0   :  { %7 = vsyncpa [#allocation3], 0  ;;  %s807_s0 = inlined_call_operand.hbm [shape: f32[16,24], index: 0, kind: input, shape index: {}]   ;;  %s808_s1 = inlined_call_operand.hbm [shape: f32[6,16,128], index: 1, kind: input, shape index: {}]   ;;  %s809_s2 = inlined_call_operand.hbm [shape: bf16[16,512], index: 2, kind: output, shape index: {}]  }
   0x1   :  { %8 = vsyncpa [#allocation6], 0 }
   0x2   :  { %9 = vsyncpa [#allocation4], 0  ;;  %s601_s9 = smov [#allocation2]   ;;  %s529_s13 = scalar_lea.hbm %s807_s0, 256 }
   0x3   :  { %s15_s10 = sshll.u32 %s601_s9, 4  ;;  %p530_p0 = scmp.ne.s32.totalorder %s807_s0, %s529_s13  ;;  %s16_s10 = int_to_ptr.vmem [resolvable:$true] %s15_s10 }
   0x4   :  { %p533_p1 = scmp.lt.u32.totalorder %s529_s13, %s807_s0 }
   0x6   :  { %p535_p2 = pnand %p533_p1, %p530_p0 }
   0x8   :  { %538 = shalt.err (!%p535_p2)
}
   0x9   :  { %s539_s18 = scalar_lea.vmem %s16_s10, 256  ;;  %p544_p4 = scmp.lt.s32.totalorder %s16_s10, %s16_s10 }
   0xa   :  { %p540_p3 = scmp.ne.s32.totalorder %s16_s10, %s539_s18  ;;  %p545_p5 = scmp.lt.s32.totalorder %s539_s18, %s539_s18 }
   0xc   :  { %p546_p6 = por %p545_p5, %p544_p4 }
   0xe   :  { %p547_p7 = pnand %p546_p6, %p540_p3 }
  0x10   :  { %550 = shalt.err (!%p547_p7)
}
  0x11   :  { %s602_s19 = smov 128   ;;  %s603_s20 = smov 8  }
  0x12   :  { %21 = dma.hbm_to_vmem [thread:$0]  %s807_s0, 256, %s16_s10, [#allocation3], %s602_s19, %s602_s19, %s603_s20  }
  0x13   :  { %s604_s23 = smov [#allocation5]   ;;  %s551_s27 = scalar_lea.hbm %s808_s1, 1536 }
  0x14   :  { %s27_s24 = sshll.u32 %s604_s23, 4  ;;  %p552_p8 = scmp.ne.s32.totalorder %s808_s1, %s551_s27  ;;  %s28_s24 = int_to_ptr.vmem [resolvable:$true] %s27_s24 }
  0x15   :  { %p555_p9 = scmp.lt.u32.totalorder %s551_s27, %s808_s1 }
  0x17   :  { %p557_p10 = pnand %p555_p9, %p552_p8 }
  0x19   :  { %560 = shalt.err (!%p557_p10)
}
  0x1a   :  { %s561_s4 = scalar_lea.vmem %s28_s24, 1536  ;;  %p566_p12 = scmp.lt.s32.totalorder %s28_s24, %s28_s24 }
  0x1b   :  { %p562_p11 = scmp.ne.s32.totalorder %s28_s24, %s561_s4  ;;  %p567_p13 = scmp.lt.s32.totalorder %s561_s4, %s561_s4 }
  0x1d   :  { %p568_p0 = por %p567_p13, %p566_p12 }
  0x1f   :  { %p569_p1 = pnand %p568_p0, %p562_p11 }
  0x21   :  { %572 = shalt.err (!%p569_p1)
}
  0x22   :  { %33 = dma.hbm_to_vmem [thread:$0]  %s808_s1, 1536, %s28_s24, [#allocation6], %s602_s19, %s602_s19, %s603_s20  }
  0x23   :  { %595 = dma.done.wait [#allocation3], 256  }
  0x24   :  { %596 = vsyncadd [#allocation3], 4294967040 }
  0x25   :  { %597 = dma.done.wait [#allocation6], 1536  }
  0x26   :  { %598 = vsyncadd [#allocation6], 4294965760  ;;  %v605_v0 = vmov 1   ;;  %v606_v1 = vmov 0   ;;  %v671_v2 = vld [vmem:[#allocation2] sm:$0xff]  ;;  %v675_v3 = vld [vmem:[#allocation2 + $0x8] sm:$0xff] }
  0x27   :  { %491 = vset.pattern.permute.xlu1 %v605_v0  ;;  %490 = vset.pattern.permute.xlu0 %v606_v1  ;;  %v607_v4 = vmov 2   ;;  %v608_v5 = vmov 3   ;;  %v609_v6 = vmov 4   ;;  %v610_v7 = vmov 5   ;;  %v721_v30 = vld [vmem:[#allocation5 + $0x10] sm:$0xff]  ;;  %v723_v31 = vld [vmem:[#allocation5] sm:$0xff] }
  0x28   :  { %62 = vperm.xlu1 %491, %v671_v2   ;;  %46 = vperm.xlu0 %490, %v671_v2   ;;  %v611_v8 = vmov 6   ;;  %v612_v9 = vmov 8   ;;  %v613_v10 = vmov 9   ;;  %v614_v11 = vmov 7   ;;  %v726_v34 = vld [vmem:[#allocation5 + $0x20] sm:$0xff]  ;;  %v730_v37 = vld [vmem:[#allocation5 + $0x30] sm:$0xff] }
  0x29   :  { %v615_v12 = vmov 11   ;;  %v616_v13 = vmov 12   ;;  %v617_v14 = vmov 18   ;;  %v618_v15 = vmov 19   ;;  %v734_v42 = vld [vmem:[#allocation5 + $0x18] sm:$0xff]  ;;  %v736_v43 = vld [vmem:[#allocation5 + $0x8] sm:$0xff] }
  0x2a   :  { %v619_v16 = vmov 10   ;;  %v620_v17 = vmov 20   ;;  %v621_v18 = vmov 15   ;;  %v622_v19 = vmov 16   ;;  %v739_v45 = vld [vmem:[#allocation5 + $0x40] sm:$0xff]  ;;  %v741_v46 = vld [vmem:[#allocation5 + $0x50] sm:$0xff] }
  0x2b   :  { %v623_v20 = vmov 22   ;;  %v624_v21 = vmov 13   ;;  %v625_v22 = vmov 23   ;;  %v626_v23 = vmov 14   ;;  %v743_v47 = vld [vmem:[#allocation5 + $0x28] sm:$0xff]  ;;  %v747_v54 = vld [vmem:[#allocation5 + $0x38] sm:$0xff] }
  0x2c   :  { %66 = vperm.xlu1 %491, %v675_v3   ;;  %51 = vperm.xlu0 %490, %v675_v3   ;;  %v627_v24 = vmov 21   ;;  %v628_v29 = vmov 17   ;;  %v752_v59 = vld [vmem:[#allocation5 + $0x48] sm:$0xff]  ;;  %s629_s1 = smov [#allocation7]  }
  0x2d   :  { %s430_s6 = sshll.u32 %s629_s1, 4  ;;  %s431_s6 = int_to_ptr.vmem [resolvable:$true] %s430_s6 }
  0x2e   :  { %s573_s7 = scalar_lea.vmem %s431_s6, 512  ;;  %p578_p3 = scmp.lt.s32.totalorder %s431_s6, %s431_s6 }
  0x2f   :  { %p574_p2 = scmp.ne.s32.totalorder %s431_s6, %s573_s7  ;;  %p579_p4 = scmp.lt.s32.totalorder %s573_s7, %s573_s7 }
  0x30   :  { %493 = vset.pattern.permute.xlu1 %v607_v4  ;;  %492 = vset.pattern.permute.xlu0 %v607_v4 }
  0x31   :  { %81 = vperm.xlu1 %493, %v675_v3   ;;  %77 = vperm.xlu0 %492, %v671_v2   ;;  %p580_p5 = por %p579_p4, %p578_p3 }
  0x33   :  { %p581_p6 = pnand %p580_p5, %p574_p2 }
  0x35   :  { %494 = vset.pattern.permute.xlu1 %v608_v5  ;;  %495 = vset.pattern.permute.xlu0 %v608_v5 }
  0x36   :  { %92 = vperm.xlu1 %494, %v671_v2   ;;  %96 = vperm.xlu0 %495, %v675_v3  }
  0x3a   :  { %496 = vset.pattern.permute.xlu1 %v609_v6  ;;  %497 = vset.pattern.permute.xlu0 %v610_v7 }
  0x3b   :  { %107 = vperm.xlu1 %496, %v671_v2   ;;  %122 = vperm.xlu0 %497, %v671_v2  }
  0x3f   :  { %111 = vperm.xlu1 %496, %v675_v3   ;;  %500 = vset.pattern.permute.xlu0 %v611_v8 }
  0x40   :  { %150 = vperm.xlu0 %500, %v675_v3  }
  0x43   :  { %498 = vset.pattern.permute.xlu1 %v610_v7 }
  0x44   :  { %126 = vperm.xlu1 %498, %v675_v3   ;;  %502 = vset.pattern.permute.xlu0 %v612_v9 }
  0x45   :  { %174 = vperm.xlu0 %502, %v671_v2  }
  0x48   :  { %499 = vset.pattern.permute.xlu1 %v611_v8 }
  0x49   :  { %146 = vperm.xlu1 %499, %v671_v2   ;;  %505 = vset.pattern.permute.xlu0 %v613_v10 }
  0x4a   :  { %192 = vperm.xlu0 %505, %v675_v3  }
  0x4d   :  { %501 = vset.pattern.permute.xlu1 %v614_v11 }
  0x4e   :  { %160 = vperm.xlu1 %501, %v671_v2   ;;  %507 = vset.pattern.permute.xlu0 %v615_v12 }
  0x4f   :  { %216 = vperm.xlu0 %507, %v671_v2  }
  0x52   :  { %164 = vperm.xlu1 %501, %v675_v3  }
  0x53   :  { %510 = vset.pattern.permute.xlu0 %v616_v13 }
  0x54   :  { %244 = vperm.xlu0 %510, %v675_v3  }
  0x56   :  { %503 = vset.pattern.permute.xlu1 %v612_v9 }
  0x57   :  { %178 = vperm.xlu1 %503, %v675_v3  }
  0x58   :  { %512 = vset.pattern.permute.xlu0 %v617_v14 }
  0x59   :  { %334 = vperm.xlu0 %512, %v671_v2  }
  0x5b   :  { %504 = vset.pattern.permute.xlu1 %v613_v10 }
  0x5c   :  { %188 = vperm.xlu1 %504, %v671_v2  }
  0x5d   :  { %515 = vset.pattern.permute.xlu0 %v618_v15 }
  0x5e   :  { %352 = vperm.xlu0 %515, %v675_v3  }
  0x60   :  { %506 = vset.pattern.permute.xlu1 %v619_v16 }
  0x61   :  { %202 = vperm.xlu1 %506, %v671_v2  }
  0x62   :  { %517 = vset.pattern.permute.xlu0 %v620_v17 }
  0x63   :  { %362 = vperm.xlu0 %517, %v671_v2  }
  0x65   :  { %206 = vperm.xlu1 %506, %v675_v3  }
  0x67   :  { %520 = vset.pattern.permute.xlu0 %v621_v18 }
  0x68   :  { %286 = vperm.xlu0 %520, %v675_v3  }
  0x69   :  { %508 = vset.pattern.permute.xlu1 %v615_v12 }
  0x6a   :  { %220 = vperm.xlu1 %508, %v675_v3  }
  0x6c   :  { %522 = vset.pattern.permute.xlu0 %v622_v19 }
  0x6d   :  { %296 = vperm.xlu0 %522, %v671_v2  }
  0x6e   :  { %509 = vset.pattern.permute.xlu1 %v616_v13 }
  0x6f   :  { %240 = vperm.xlu1 %509, %v671_v2  }
  0x71   :  { %525 = vset.pattern.permute.xlu0 %v623_v20 }
  0x72   :  { %394 = vperm.xlu0 %525, %v675_v3  }
  0x73   :  { %511 = vset.pattern.permute.xlu1 %v624_v21 }
  0x74   :  { %254 = vperm.xlu1 %511, %v671_v2  }
  0x76   :  { %527 = vset.pattern.permute.xlu0 %v625_v22 }
  0x77   :  { %404 = vperm.xlu0 %527, %v671_v2  }
  0x78   :  { %258 = vperm.xlu1 %511, %v675_v3  }
  0x7c   :  { %513 = vset.pattern.permute.xlu1 %v617_v14 }
  0x7d   :  { %338 = vperm.xlu1 %513, %v675_v3  }
  0x81   :  { %514 = vset.pattern.permute.xlu1 %v618_v15 }
  0x82   :  { %348 = vperm.xlu1 %514, %v671_v2  }
  0x86   :  { %516 = vset.pattern.permute.xlu1 %v626_v23 }
  0x87   :  { %268 = vperm.xlu1 %516, %v671_v2  }
  0x8b   :  { %272 = vperm.xlu1 %516, %v675_v3  }
  0x8f   :  { %518 = vset.pattern.permute.xlu1 %v620_v17 }
  0x90   :  { %366 = vperm.xlu1 %518, %v675_v3  }
  0x94   :  { %519 = vset.pattern.permute.xlu1 %v621_v18 }
  0x95   :  { %282 = vperm.xlu1 %519, %v671_v2  }
  0x99   :  { %521 = vset.pattern.permute.xlu1 %v627_v24 }
  0x9a   :  { %376 = vperm.xlu1 %521, %v671_v2  }
  0x9e   :  { %380 = vperm.xlu1 %521, %v675_v3  }
  0xa2   :  { %523 = vset.pattern.permute.xlu1 %v622_v19 }
  0xa3   :  { %300 = vperm.xlu1 %523, %v675_v3  }
  0xa7   :  { %524 = vset.pattern.permute.xlu1 %v623_v20  ;;  %v63_v25 = vpop.permute.xlu1 %62  ;;  %v47_v26 = vpop.permute.xlu0 %46 }
  0xa8   :  { %390 = vperm.xlu1 %524, %v671_v2   ;;  %v69_v35 = vmul.f32 %v63_v25, %v721_v30  ;;  %v54_v36 = vmul.f32 %v47_v26, %v723_v31 }
  0xaa   :  { %v71_v41 = vadd.f32 %v69_v35, %v54_v36 }
  0xab   :  { %v67_v27 = vpop.permute.xlu1 %66  ;;  %v52_v28 = vpop.permute.xlu0 %51 }
  0xac   :  { %526 = vset.pattern.permute.xlu1 %v628_v29  ;;  %v70_v49 = vmul.f32 %v67_v27, %v734_v42  ;;  %v55_v50 = vmul.f32 %v52_v28, %v736_v43 }
  0xad   :  { %310 = vperm.xlu1 %526, %v671_v2  }
  0xae   :  { %v72_v60 = vadd.f32 %v70_v49, %v55_v50 }
  0xb0   :  { %v82_v32 = vpop.permute.xlu1 %81  ;;  %v78_v33 = vpop.permute.xlu0 %77 }
  0xb1   :  { %314 = vperm.xlu1 %526, %v675_v3   ;;  %v84_v38 = vmul.f32 %v78_v33, %v726_v34  ;;  %v85_v57 = vmul.f32 %v82_v32, %v743_v47 }
  0xb3   :  { %v86_v48 = vadd.f32 %v84_v38, %v71_v41  ;;  %v87_v0 = vadd.f32 %v85_v57, %v72_v60 }
  0xb5   :  { %528 = vset.pattern.permute.xlu1 %v625_v22  ;;  %v93_v39 = vpop.permute.xlu1 %92  ;;  %v97_v40 = vpop.permute.xlu0 %96 }
  0xb6   :  { %408 = vperm.xlu1 %528, %v675_v3   ;;  %v99_v44 = vmul.f32 %v93_v39, %v730_v37  ;;  %v100_v61 = vmul.f32 %v97_v40, %v747_v54  ;;  %v756_v3 = vld [vmem:[#allocation5 + $0x58] sm:$0xff] }
  0xb8   :  { %v101_v53 = vadd.f32 %v99_v44, %v86_v48  ;;  %v102_v4 = vadd.f32 %v100_v61, %v87_v0 }
  0xba   :  { %v108_v51 = vpop.permute.xlu1 %107  ;;  %v123_v52 = vpop.permute.xlu0 %122 }
  0xbb   :  { %v114_v55 = vmul.f32 %v108_v51, %v739_v45  ;;  %v129_v56 = vmul.f32 %v123_v52, %v741_v46 }
  0xbd   :  { %v116_v58 = vadd.f32 %v114_v55, %v101_v53 }
  0xbe   :  { %v112_v62 = vpop.permute.xlu1 %111 }
  0xbf   :  { %v131_v63 = vadd.f32 %v129_v56, %v116_v58  ;;  %v115_v1 = vmul.f32 %v112_v62, %v752_v59  ;;  %v151_v12 = vpop.permute.xlu0 %150 }
  0xc0   :  { %v154_v23 = vmul.f32 %v151_v12, %v736_v43 }
  0xc1   :  { %v451_v2 = vpack.c.bf16 %v131_v63, %v131_v63  ;;  %v117_v6 = vadd.f32 %v115_v1, %v102_v4 }
  0xc3   :  { %141 = vst [vmem:[#allocation7] sm:$0xf] %v451_v2  ;;  %v127_v5 = vpop.permute.xlu1 %126 }
  0xc4   :  { %v130_v7 = vmul.f32 %v127_v5, %v756_v3  ;;  %v175_v14 = vpop.permute.xlu0 %174 }
  0xc5   :  { %v181_v20 = vmul.f32 %v175_v14, %v726_v34 }
  0xc6   :  { %v132_v8 = vadd.f32 %v130_v7, %v117_v6 }
  0xc8   :  { %v452_v9 = vpack.c.bf16 %v132_v8, %v132_v8  ;;  %v147_v10 = vpop.permute.xlu1 %146 }
  0xc9   :  { %v153_v17 = vmul.f32 %v147_v10, %v723_v31  ;;  %v193_v18 = vpop.permute.xlu0 %192 }
  0xca   :  { %142 = vst [vmem:[#allocation7 + $0x10] sm:$0xf] %v452_v9  ;;  %v196_v39 = vmul.f32 %v193_v18, %v747_v54 }
  0xcd   :  { %v161_v11 = vpop.permute.xlu1 %160 }
  0xce   :  { %v167_v16 = vmul.f32 %v161_v11, %v721_v30  ;;  %v217_v25 = vpop.permute.xlu0 %216 }
  0xcf   :  { %v223_v33 = vmul.f32 %v217_v25, %v741_v46 }
  0xd0   :  { %v169_v19 = vadd.f32 %v167_v16, %v153_v17 }
  0xd1   :  { %v165_v13 = vpop.permute.xlu1 %164 }
  0xd2   :  { %v168_v24 = vmul.f32 %v165_v13, %v734_v42  ;;  %v183_v26 = vadd.f32 %v181_v20, %v169_v19 }
  0xd3   :  { %v245_v62 = vpop.permute.xlu0 %244 }
  0xd4   :  { %v170_v35 = vadd.f32 %v168_v24, %v154_v23 }
  0xd6   :  { %v179_v15 = vpop.permute.xlu1 %178 }
  0xd7   :  { %v182_v27 = vmul.f32 %v179_v15, %v743_v47 }
  0xd8   :  { %v335_v1 = vpop.permute.xlu0 %334 }
  0xd9   :  { %v184_v38 = vadd.f32 %v182_v27, %v170_v35  ;;  %v341_v11 = vmul.f32 %v335_v1, %v723_v31 }
  0xdb   :  { %v189_v21 = vpop.permute.xlu1 %188  ;;  %v198_v49 = vadd.f32 %v196_v39, %v184_v38 }
  0xdc   :  { %v195_v22 = vmul.f32 %v189_v21, %v730_v37 }
  0xdd   :  { %v353_v4 = vpop.permute.xlu0 %352 }
  0xde   :  { %v197_v29 = vadd.f32 %v195_v22, %v183_v26  ;;  %v248_v22 = vmul.f32 %v245_v62, %v736_v43  ;;  %v356_v38 = vmul.f32 %v353_v4, %v734_v42 }
  0xe0   :  { %v203_v28 = vpop.permute.xlu1 %202 }
  0xe1   :  { %v209_v32 = vmul.f32 %v203_v28, %v739_v45 }
  0xe2   :  { %v363_v6 = vpop.permute.xlu0 %362 }
  0xe3   :  { %v211_v36 = vadd.f32 %v209_v32, %v197_v29  ;;  %v369_v16 = vmul.f32 %v363_v6, %v726_v34 }
  0xe4   :  { %v207_v40 = vpop.permute.xlu1 %206 }
  0xe5   :  { %v225_v41 = vadd.f32 %v223_v33, %v211_v36  ;;  %v210_v44 = vmul.f32 %v207_v40, %v752_v59 }
  0xe7   :  { %v453_v48 = vpack.c.bf16 %v225_v41, %v225_v41  ;;  %v212_v51 = vadd.f32 %v210_v44, %v198_v49  ;;  %v287_v7 = vpop.permute.xlu0 %286 }
  0xe8   :  { %v290_v40 = vmul.f32 %v287_v7, %v747_v54 }
  0xe9   :  { %235 = vst [vmem:[#allocation7 + $0x4] sm:$0xf] %v453_v48  ;;  %v221_v50 = vpop.permute.xlu1 %220 }
  0xea   :  { %v224_v52 = vmul.f32 %v221_v50, %v756_v3 }
  0xec   :  { %v226_v53 = vadd.f32 %v224_v52, %v212_v51  ;;  %v297_v9 = vpop.permute.xlu0 %296 }
  0xed   :  { %v303_v35 = vmul.f32 %v297_v9, %v739_v45 }
  0xee   :  { %v454_v55 = vpack.c.bf16 %v226_v53, %v226_v53  ;;  %v241_v56 = vpop.permute.xlu1 %240 }
  0xef   :  { %v247_v18 = vmul.f32 %v241_v56, %v723_v31 }
  0xf0   :  { %236 = vst [vmem:[#allocation7 + $0x14] sm:$0xf] %v454_v55 }
  0xf1   :  { %v395_v14 = vpop.permute.xlu0 %394 }
  0xf3   :  { %v255_v57 = vpop.permute.xlu1 %254 }
  0xf4   :  { %v261_v13 = vmul.f32 %v255_v57, %v721_v30 }
  0xf6   :  { %v263_v21 = vadd.f32 %v261_v13, %v247_v18  ;;  %v405_v25 = vpop.permute.xlu0 %404 }
  0xf7   :  { %v259_v58 = vpop.permute.xlu1 %258 }
  0xf8   :  { %v262_v23 = vmul.f32 %v259_v58, %v734_v42 }
  0xfa   :  { %v264_v32 = vadd.f32 %v262_v23, %v248_v22 }
  0xfc   :  { %v339_v60 = vpop.permute.xlu1 %338 }
  0xfd   :  { %v342_v36 = vmul.f32 %v339_v60, %v736_v43 }
  0xff   :  { %v358_v52 = vadd.f32 %v356_v38, %v342_v36 }
 0x101   :  { %v349_v61 = vpop.permute.xlu1 %348 }
 0x102   :  { %v355_v12 = vmul.f32 %v349_v61, %v721_v30  ;;  %v398_v61 = vmul.f32 %v395_v14, %v752_v59 }
 0x104   :  { %v357_v15 = vadd.f32 %v355_v12, %v341_v11 }
 0x106   :  { %v269_v63 = vpop.permute.xlu1 %268  ;;  %v371_v30 = vadd.f32 %v369_v16, %v357_v15 }
 0x107   :  { %v275_v19 = vmul.f32 %v269_v63, %v726_v34  ;;  %v411_v34 = vmul.f32 %v405_v25, %v741_v46 }
 0x109   :  { %v277_v26 = vadd.f32 %v275_v19, %v263_v21 }
 0x10a   :  { %v273_v0 = vpop.permute.xlu1 %272 }
 0x10b   :  { %v276_v27 = vmul.f32 %v273_v0, %v743_v47 }
 0x10d   :  { %v278_v39 = vadd.f32 %v276_v27, %v264_v32 }
 0x10f   :  { %v367_v2 = vpop.permute.xlu1 %366  ;;  %v292_v43 = vadd.f32 %v290_v40, %v278_v39 }
 0x110   :  { %v370_v41 = vmul.f32 %v367_v2, %v743_v47 }
 0x112   :  { %v372_v42 = vadd.f32 %v370_v41, %v358_v52 }
 0x114   :  { %v283_v5 = vpop.permute.xlu1 %282 }
 0x115   :  { %v289_v24 = vmul.f32 %v283_v5, %v730_v37 }
 0x117   :  { %v291_v33 = vadd.f32 %v289_v24, %v277_v26 }
 0x119   :  { %v377_v8 = vpop.permute.xlu1 %376  ;;  %v305_v49 = vadd.f32 %v303_v35, %v291_v33 }
 0x11a   :  { %v383_v20 = vmul.f32 %v377_v8, %v730_v37 }
 0x11c   :  { %v385_v29 = vadd.f32 %v383_v20, %v371_v30 }
 0x11d   :  { %v381_v10 = vpop.permute.xlu1 %380 }
 0x122   :  { %v301_v17 = vpop.permute.xlu1 %300 }
 0x123   :  { %v304_v50 = vmul.f32 %v301_v17, %v752_v59 }
 0x125   :  { %v306_v57 = vadd.f32 %v304_v50, %v292_v43 }
 0x127   :  { %v391_v28 = vpop.permute.xlu1 %390 }
 0x128   :  { %v397_v31 = vmul.f32 %v391_v28, %v739_v45  ;;  %v384_v45 = vmul.f32 %v381_v10, %v747_v54 }
 0x12a   :  { %v399_v37 = vadd.f32 %v397_v31, %v385_v29  ;;  %v386_v60 = vadd.f32 %v384_v45, %v372_v42 }
 0x12c   :  { %v413_v44 = vadd.f32 %v411_v34, %v399_v37  ;;  %v311_v48 = vpop.permute.xlu1 %310  ;;  %v400_v0 = vadd.f32 %v398_v61, %v386_v60 }
 0x12d   :  { %v317_v51 = vmul.f32 %v311_v48, %v741_v46 }
 0x12e   :  { %v457_v53 = vpack.c.bf16 %v413_v44, %v413_v44 }
 0x12f   :  { %v319_v55 = vadd.f32 %v317_v51, %v305_v49 }
 0x130   :  { %423 = vst [vmem:[#allocation7 + $0xc] sm:$0xf] %v457_v53  ;;  %v315_v56 = vpop.permute.xlu1 %314 }
 0x131   :  { %v455_v58 = vpack.c.bf16 %v319_v55, %v319_v55  ;;  %v318_v47 = vmul.f32 %v315_v56, %v756_v3 }
 0x133   :  { %329 = vst [vmem:[#allocation7 + $0x8] sm:$0xf] %v455_v58  ;;  %v320_v62 = vadd.f32 %v318_v47, %v306_v57 }
 0x135   :  { %v456_v63 = vpack.c.bf16 %v320_v62, %v320_v62  ;;  %v409_v46 = vpop.permute.xlu1 %408 }
 0x136   :  { %v412_v54 = vmul.f32 %v409_v46, %v756_v3 }
 0x137   :  { %330 = vst [vmem:[#allocation7 + $0x18] sm:$0xf] %v456_v63 }
 0x138   :  { %v414_v1 = vadd.f32 %v412_v54, %v400_v0 }
 0x13a   :  { %v458_v2 = vpack.c.bf16 %v414_v1, %v414_v1 }
 0x13c   :  { %424 = vst [vmem:[#allocation7 + $0x1c] sm:$0xf] %v458_v2 }
 0x13d   :  { %584 = shalt.err (!%p581_p6)
}
 0x13e   :  { %s585_s10 = scalar_lea.hbm %s809_s2, 512 }
 0x13f   :  { %p586_p7 = scmp.ne.s32.totalorder %s809_s2, %s585_s10  ;;  %p589_p8 = scmp.lt.u32.totalorder %s585_s10, %s809_s2 }
 0x141   :  { %p591_p9 = pnand %p589_p8, %p586_p7 }
 0x143   :  { %594 = shalt.err (!%p591_p9)
}
 0x144   :  { %s630_s15 = smov 256   ;;  %s631_s16 = smov 16  }
 0x145   :  { %436 = dma.vmem_to_hbm [thread:$0]  %s431_s6, 512, %s809_s2, [#allocation4], %s630_s15, %s630_s15, %s631_s16  }
 0x146   :  { %599 = dma.done.wait [#allocation4], 512  }
 0x147   :  { %600 = vsyncadd [#allocation4], 4294966784 }
 0x148   :  { %440 = vsyncpa [#allocation3], 1 }
 0x149   :  { %441 = vsyncpa [#allocation6], 1 }
 0x14a   :  { %442 = vsyncpa [#allocation4], 1 }

</bundles_post_ra>
